<compile_context>
chip_gen: v5e
topology: v5e:2x2
jax: 0.10.0
libtpu: 0.0.40
codegen_flags: <defaults>
</compile_context>

<pallas_src>
import jax
import jax.numpy as jnp
from jax.experimental import pallas as pl
from jax.experimental.pallas import tpu as pltpu


def _round_up(x: int, m: int) -> int:
    return (x + m - 1) // m * m


def linear_model_kernel(x_ref, wt_ref, bias_ref, o_ref):
    # x_ref:    (bm, K)      batch tile, K = full inputSize (no padding)
    # wt_ref:   (K, tn)      W^T tile (lane-dense N), grid-invariant when tn == N_pad
    # bias_ref: (1, tn)      folded bias = linear_bias + b (f32)
    # o_ref:    (bm, tn)     lane-dense output tile
    x = x_ref[...]
    wt = wt_ref[...]
    if x.dtype != wt.dtype:
        # In-VMEM cast (e.g. f32 activations vs bf16 weights): avoids a separate
        # wrapper-side HBM read+write pass over x.
        x = x.astype(wt.dtype)
    acc = jnp.dot(x, wt, preferred_element_type=jnp.float32)
    o_ref[...] = (acc + bias_ref[...]).astype(o_ref.dtype)


def prepare_linear_model_params(w, lin_bias, b, *, weight_dtype=None):
    """One-time parameter layout prep (hoisted out of the per-call path).

    w:        (outputSize, inputSize)  -- nn.Linear weight layout
    lin_bias: (outputSize,)
    b:        (outputSize,)
    Returns:
      wt_padded:   (inputSize, N_pad)   W^T with lane-dense (multiple-of-128) N padding
      bias_padded: (1, N_pad)           folded bias = lin_bias + b, f32
    """
    out_size, in_size = w.shape
    N_pad = _round_up(max(out_size, 1), 128)
    wt = w.T                                            # (inputSize, outputSize)
    if out_size != N_pad:
        wt = jnp.pad(wt, ((0, 0), (0, N_pad - out_size)))
    if weight_dtype is not None:
        wt = wt.astype(weight_dtype)
    bias = lin_bias.astype(jnp.float32) + b.astype(jnp.float32)
    bias = jnp.pad(bias, (0, N_pad - out_size)).reshape(1, N_pad)
    return wt, bias


def linear_model_forward(x, wt_padded, bias_padded, out_size, *,
                         bm_max=256, tn_max=512, out_dtype=None):
    """out = x @ W^T + lin_bias + b computed in a Pallas TPU kernel.

    x:           (B, inputSize) activations (streamed as-is, no wrapper-side cast/pad)
    wt_padded:   (inputSize, N_pad) from prepare_linear_model_params
    bias_padded: (1, N_pad)        from prepare_linear_model_params
    out_size:    true outputSize (padded lanes are sliced off)
    out_dtype:   optional output dtype (e.g. jnp.bfloat16 to halve store bytes on v5e)
    """
    B, K = x.shape
    Kw, N_pad = wt_padded.shape
    assert Kw == K, "prepared weight K does not match x"
    assert bias_padded.shape == (1, N_pad)
    out_dtype = x.dtype if out_dtype is None else out_dtype

    # ---- batch tiling: no batch padding; >= 2 steps when B > 16 (v7x megacore) ----
    bm_max = max(8, (min(bm_max, 1024) // 8) * 8)
    nb = pl.cdiv(B, bm_max)
    if B > 16 and nb < 2:
        nb = 2
    if nb == 1:
        bm = B                      # full-dim block: exempt from the 8-multiple rule
    else:
        bm = min(_round_up(pl.cdiv(B, nb), 8), bm_max)
        nb = pl.cdiv(B, bm)         # ragged last tile handled by Pallas masking

    # ---- N tiling: lane-dense, prefer 256-aligned tiles (v6e/v7x 256-wide MXU) ----
    if N_pad <= tn_max:
        tn = N_pad
    elif N_pad % tn_max == 0:
        tn = tn_max
    elif N_pad % 256 == 0:
        tn = 256
    else:
        tn = 128
    nn = N_pad // tn
    grid = (nb, nn)
    weight_invariant = (nn == 1)

    # ---- advisory cost from unpadded work ----
    xb = jnp.dtype(x.dtype).itemsize
    wb = jnp.dtype(wt_padded.dtype).itemsize
    ob = jnp.dtype(out_dtype).itemsize
    cost = pl.CostEstimate(
        flops=2 * B * K * out_size,
        transcendentals=0,
        bytes_accessed=(B * K * xb + K * out_size * wb + out_size * 4
                        + B * out_size * ob),
    )

    # ---- VMEM budget from actual tile footprint (+headroom), capped for v7x ----
    w_bufs = 1 if weight_invariant else 2
    vmem_need = (2 * bm * K * xb              # x tiles, double-buffered
                 + w_bufs * K * tn * wb       # weight tile(s)
                 + w_bufs * tn * 4            # bias tile(s)
                 + 2 * bm * tn * ob)          # output tiles, double-buffered
    vmem_limit = int(min(max(int(1.5 * vmem_need) + (2 << 20), 4 << 20), 48 << 20))

    def run(single_buffer_invariant):
        if single_buffer_invariant and weight_invariant:
            wt_spec = pl.BlockSpec((K, tn), lambda i, j: (0, j),
                                   pipeline_mode=pl.Buffered(1))
            bias_spec = pl.BlockSpec((1, tn), lambda i, j: (0, j),
                                     pipeline_mode=pl.Buffered(1))
        else:
            wt_spec = pl.BlockSpec((K, tn), lambda i, j: (0, j))
            bias_spec = pl.BlockSpec((1, tn), lambda i, j: (0, j))
        return pl.pallas_call(
            linear_model_kernel,
            out_shape=jax.ShapeDtypeStruct((B, N_pad), out_dtype),
            grid_spec=pltpu.PrefetchScalarGridSpec(
                num_scalar_prefetch=0,
                grid=grid,
                in_specs=[
                    pl.BlockSpec((bm, K), lambda i, j: (i, 0)),   # x tile (full K)
                    wt_spec,                                       # W^T tile
                    bias_spec,                                     # folded bias
                ],
                out_specs=pl.BlockSpec((bm, tn), lambda i, j: (i, j)),
            ),
            compiler_params=pltpu.CompilerParams(
                dimension_semantics=("parallel", "parallel"),
                vmem_limit_bytes=vmem_limit,
            ),
            cost_estimate=cost,
        )(x, wt_padded, bias_padded)

    try:
        out_padded = run(single_buffer_invariant=True)
    except Exception:
        # Fallback for jax versions that reject pipeline_mode=pl.Buffered(1)
        # on a top-level pallas_call BlockSpec.
        out_padded = run(single_buffer_invariant=False)

    return out_padded[:, :out_size]


if __name__ == "__main__":
    input_size = 32
    output_size = 32
    batch = 8

    key = jax.random.PRNGKey(0)
    kx, kw, kb = jax.random.split(key, 3)

    # Deterministic parameter init (shapes match nn.Linear(inputSize, outputSize)
    # plus nn.Parameter(torch.ones(outputSize))).
    x = jax.random.normal(kx, (batch, input_size), dtype=jnp.float32)
    bound = 1.0 / (input_size ** 0.5)
    w = jax.random.uniform(kw, (output_size, input_size),
                           minval=-bound, maxval=bound, dtype=jnp.float32)
    lin_bias = jax.random.uniform(kb, (output_size,),
                                  minval=-bound, maxval=bound, dtype=jnp.float32)
    b = jnp.ones((output_size,), dtype=jnp.float32)   # torch.ones(outputSize)

    ref = x @ w.T + lin_bias + b

    # f32 weights (exact semantics of the module). Params prepared once, reused.
    wt_f32, bias_f32 = prepare_linear_model_params(w, lin_bias, b)
    out = jax.block_until_ready(
        linear_model_forward(x, wt_f32, bias_f32, output_size))
    assert out.shape == (batch, output_size)
    assert jnp.allclose(out, ref, atol=1e-5, rtol=1e-5)

    # bf16 weights (MXU-friendly on v5e/v6e/v7x); x stays f32 in HBM and is cast
    # in-kernel on the VMEM tile. Accumulation stays f32.
    wt_bf16, bias_bf = prepare_linear_model_params(w, lin_bias, b,
                                                   weight_dtype=jnp.bfloat16)
    out_bf16 = jax.block_until_ready(
        linear_model_forward(x, wt_bf16, bias_bf, output_size))
    assert out_bf16.shape == (batch, output_size)
    assert jnp.allclose(out_bf16, ref, atol=3e-2, rtol=3e-2)

    print("KERNEL_OK")
</pallas_src>

<mosaic_0001>
module attributes {stable_mosaic.version = 11 : i64} {
  func.func @linear_model_kernel(%arg0: i32, %arg1: i32, %arg2: memref<8x32xf32, #tpu.memory_space<vmem>>, %arg3: memref<32x128xf32, #tpu.memory_space<vmem>>, %arg4: memref<1x128xf32, #tpu.memory_space<vmem>>, %arg5: memref<8x128xf32, #tpu.memory_space<vmem>>) attributes {dimension_semantics = [#tpu.dimension_semantics<parallel>, #tpu.dimension_semantics<parallel>], iteration_bounds = array<i64: 1, 1>, scalar_prefetch = 0 : i64, scratch_operands = 0 : i64, tpu.core_type = #tpu.core_type<tc>, window_params = [{transform_indices = @transform_0, window_bounds = array<i64: 8, 32>}, {pipeline_mode = #tpu.pipeline_mode<synchronous>, transform_indices = @transform_1, window_bounds = array<i64: 32, 128>}, {pipeline_mode = #tpu.pipeline_mode<synchronous>, transform_indices = @transform_2, window_bounds = array<i64: 1, 128>}, {transform_indices = @transform_3, window_bounds = array<i64: 8, 128>}]} {
    %c0 = arith.constant 0 : index
    %c0_0 = arith.constant 0 : index
    %0 = vector.load %arg2[%c0, %c0_0] : memref<8x32xf32, #tpu.memory_space<vmem>>, vector<8x32xf32>
    %c0_1 = arith.constant 0 : index
    %c0_2 = arith.constant 0 : index
    %1 = vector.load %arg3[%c0_1, %c0_2] : memref<32x128xf32, #tpu.memory_space<vmem>>, vector<32x128xf32>
    %cst = arith.constant dense<0.000000e+00> : vector<8x128xf32>
    %2 = tpu.matmul %0, %1, %cst {dimension_numbers = #tpu.dot_dimension_numbers<[1], [0], [0], [1], [0, 0, 1, 1], [], []>} : vector<8x32xf32>, vector<32x128xf32>, vector<8x128xf32> -> vector<8x128xf32>
    %c0_3 = arith.constant 0 : index
    %c0_4 = arith.constant 0 : index
    %3 = vector.load %arg4[%c0_3, %c0_4] : memref<1x128xf32, #tpu.memory_space<vmem>>, vector<1x128xf32>
    %4 = vector.broadcast %3 : vector<1x128xf32> to vector<8x128xf32>
    %5 = arith.addf %2, %4 : vector<8x128xf32>
    %c0_5 = arith.constant 0 : index
    %c0_6 = arith.constant 0 : index
    %6 = vector.load %arg5[%c0_5, %c0_6] : memref<8x128xf32, #tpu.memory_space<vmem>>, vector<8x128xf32>
    tpu.vector_store %arg5[%c0_5, %c0_6], %5 {strides = array<i32>} : memref<8x128xf32, #tpu.memory_space<vmem>>, vector<8x128xf32>,
    return
  }
  func.func @transform_0(%arg0: i32, %arg1: i32) -> (i32, i32) {
    %c0_i32 = arith.constant 0 : i32
    %c0_i32_0 = arith.constant 0 : i32
    return %arg0, %c0_i32 : i32, i32
  }
  func.func @transform_1(%arg0: i32, %arg1: i32) -> (i32, i32) {
    %c0_i32 = arith.constant 0 : i32
    %c0_i32_0 = arith.constant 0 : i32
    return %c0_i32, %arg1 : i32, i32
  }
  func.func @transform_2(%arg0: i32, %arg1: i32) -> (i32, i32) {
    %c0_i32 = arith.constant 0 : i32
    %c0_i32_0 = arith.constant 0 : i32
    return %c0_i32, %arg1 : i32, i32
  }
  func.func @transform_3(%arg0: i32, %arg1: i32) -> (i32, i32) {
    %c0_i32 = arith.constant 0 : i32
    return %arg0, %arg1 : i32, i32
  }
}

module attributes {stable_mosaic.version = 11 : i64} {
  func.func @linear_model_kernel(%arg0: i32, %arg1: i32, %arg2: memref<8x32xf32, #tpu.memory_space<vmem>>, %arg3: memref<32x128xf32, #tpu.memory_space<vmem>>, %arg4: memref<1x128xf32, #tpu.memory_space<vmem>>, %arg5: memref<8x128xf32, #tpu.memory_space<vmem>>) attributes {dimension_semantics = [#tpu.dimension_semantics<parallel>, #tpu.dimension_semantics<parallel>], iteration_bounds = array<i64: 1, 1>, scalar_prefetch = 0 : i64, scratch_operands = 0 : i64, tpu.core_type = #tpu.core_type<tc>, window_params = [{transform_indices = @transform_0, window_bounds = array<i64: 8, 32>}, {transform_indices = @transform_1, window_bounds = array<i64: 32, 128>}, {transform_indices = @transform_2, window_bounds = array<i64: 1, 128>}, {transform_indices = @transform_3, window_bounds = array<i64: 8, 128>}]} {
    %c0 = arith.constant 0 : index
    %c0_0 = arith.constant 0 : index
    %0 = vector.load %arg2[%c0, %c0_0] : memref<8x32xf32, #tpu.memory_space<vmem>>, vector<8x32xf32>
    %c0_1 = arith.constant 0 : index
    %c0_2 = arith.constant 0 : index
    %1 = vector.load %arg3[%c0_1, %c0_2] : memref<32x128xf32, #tpu.memory_space<vmem>>, vector<32x128xf32>
    %cst = arith.constant dense<0.000000e+00> : vector<8x128xf32>
    %2 = tpu.matmul %0, %1, %cst {dimension_numbers = #tpu.dot_dimension_numbers<[1], [0], [0], [1], [0, 0, 1, 1], [], []>} : vector<8x32xf32>, vector<32x128xf32>, vector<8x128xf32> -> vector<8x128xf32>
    %c0_3 = arith.constant 0 : index
    %c0_4 = arith.constant 0 : index
    %3 = vector.load %arg4[%c0_3, %c0_4] : memref<1x128xf32, #tpu.memory_space<vmem>>, vector<1x128xf32>
    %4 = vector.broadcast %3 : vector<1x128xf32> to vector<8x128xf32>
    %5 = arith.addf %2, %4 : vector<8x128xf32>
    %c0_5 = arith.constant 0 : index
    %c0_6 = arith.constant 0 : index
    %6 = vector.load %arg5[%c0_5, %c0_6] : memref<8x128xf32, #tpu.memory_space<vmem>>, vector<8x128xf32>
    tpu.vector_store %arg5[%c0_5, %c0_6], %5 {strides = array<i32>} : memref<8x128xf32, #tpu.memory_space<vmem>>, vector<8x128xf32>,
    return
  }
  func.func @transform_0(%arg0: i32, %arg1: i32) -> (i32, i32) {
    %c0_i32 = arith.constant 0 : i32
    %c0_i32_0 = arith.constant 0 : i32
    return %arg0, %c0_i32 : i32, i32
  }
  func.func @transform_1(%arg0: i32, %arg1: i32) -> (i32, i32) {
    %c0_i32 = arith.constant 0 : i32
    %c0_i32_0 = arith.constant 0 : i32
    return %c0_i32, %arg1 : i32, i32
  }
  func.func @transform_2(%arg0: i32, %arg1: i32) -> (i32, i32) {
    %c0_i32 = arith.constant 0 : i32
    %c0_i32_0 = arith.constant 0 : i32
    return %c0_i32, %arg1 : i32, i32
  }
  func.func @transform_3(%arg0: i32, %arg1: i32) -> (i32, i32) {
    %c0_i32 = arith.constant 0 : i32
    return %arg0, %arg1 : i32, i32
  }
}

</mosaic_0001>

<bundles_post_ra>
// kernel: tpu_custom_call.1
= control target key start
LH: loop header
LB: loop body
LE: loop exit
PB: predicated region body
PF: predicated region fallthrough
CT: control target
= control target key end

     0   :  { %8 = vsyncpa [#allocation3], 0  ;;  %s219_s0 = inlined_call_operand.hbm [shape: f32[8,32], index: 0, kind: input, shape index: {}]   ;;  %s220_s1 = inlined_call_operand.hbm [shape: f32[32,128], index: 1, kind: input, shape index: {}]   ;;  %s221_s2 = inlined_call_operand.vmem [shape: f32[1,128], index: 2, kind: input, shape index: {}]   ;;  %s222_s3 = inlined_call_operand.hbm [shape: f32[8,128], index: 3, kind: output, shape index: {}]  }
   0x1   :  { %9 = vsyncpa [#allocation6], 0 }
   0x2   :  { %10 = vsyncpa [#allocation4], 0  ;;  %s16_s14 = sshll.u32 %s219_s0, 4  ;;  %s182_s15 = smov [#allocation2]   ;;  %s17_s14 = int_to_ptr.hbm [resolvable:$true] %s16_s14 }
   0x3   :  { %s18_s16 = sshll.u32 %s182_s15, 4  ;;  %s26_s19 = sshll.u32 %s220_s1, 4  ;;  %s19_s16 = int_to_ptr.vmem [resolvable:$true] %s18_s16  ;;  %s27_s19 = int_to_ptr.hbm [resolvable:$true] %s26_s19 }
   0x4   :  { %21 = dma.hbm_to_vmem [thread:$0]  %s17_s14, 128, %s19_s16, [#allocation3]  }
   0x5   :  { %s183_s20 = smov [#allocation5]   ;;  %s184_s22 = smov 128  }
   0x6   :  { %s28_s21 = sshll.u32 %s183_s20, 4  ;;  %s185_s23 = smov 8   ;;  %s29_s21 = int_to_ptr.vmem [resolvable:$true] %s28_s21 }
   0x7   :  { %34 = dma.hbm_to_vmem [thread:$0]  %s27_s19, 512, %s29_s21, [#allocation6], %s184_s22, %s184_s22, %s185_s23  }
   0x8   :  { %176 = dma.done.wait [#allocation3], 128  }
   0x9   :  { %177 = vsyncadd [#allocation3], 4294967168 }
   0xa   :  { %178 = dma.done.wait [#allocation6], 512  }
   0xb   :  { %179 = vsyncadd [#allocation6], 4294966784  ;;  %v49_v0 = vld [vmem:[#allocation5 + $0x18] sm:$0xff]  ;;  %v48_v1 = vld [vmem:[#allocation5 + $0x10] sm:$0xff]  ;;  %vm54_vm0 = vcmask 261120   ;;  %s186_s24 = smov [#allocation7]  }
   0xc   :  { %70 = vmatpush.msra.mxu0 %v49_v0  ;;  %v47_v2 = vld [vmem:[#allocation5 + $0x8] sm:$0xff]  ;;  %v46_v3 = vld [vmem:[#allocation5] sm:$0xff]  ;;  %v45_v4 = vld [vmem:[#allocation2] sm:$0xff]  ;;  %s84_s25 = sshll.u32 %s186_s24, 4  ;;  %s86_s28 = sshll.u32 %s222_s3, 4  ;;  %s85_s25 = int_to_ptr.vmem [resolvable:$true] %s84_s25  ;;  %s87_s28 = int_to_ptr.hbm [resolvable:$true] %s86_s28 }
   0xd   :  { %v103_v5 = vld [vmem:[%s221_s2] ss:$0 sm:$0xff] }
   0xe   :  { %71 = vmatpush.msra.mxu0 %v48_v1 }
  0x10   :  { %72 = vmatpush.msra.mxu0 %v47_v2 }
  0x12   :  { %73 = vmatpush.msra.mxu0 %v46_v3 }
  0x13   :  { %97 = vmatmul.msk.f32.vlgmr.msra.gmra.mxu0 %vm54_vm0, %v45_v4 }
  0x90   :  { %v75_v6 = vpop.f32.mrf.mxu0 }
  0x91   :  { %v76_v7 = vadd.f32 %v103_v5, %v75_v6 }
  0x93   :  { %78 = vst [vmem:[#allocation7] sm:$0xff] %v76_v7 }
  0x94   :  { %89 = dma.vmem_to_hbm [thread:$0]  %s85_s25, 128, %s87_s28, [#allocation4]  }
  0x95   :  { %180 = dma.done.wait [#allocation4], 128  }
  0x96   :  { %181 = vsyncadd [#allocation4], 4294967168 }
  0x97   :  { %94 = vsyncpa [#allocation3], 1 }
  0x98   :  { %95 = vsyncpa [#allocation6], 1 }
  0x99   :  { %96 = vsyncpa [#allocation4], 1 }

// kernel: tpu_custom_call.1
= control target key start
LH: loop header
LB: loop body
LE: loop exit
PB: predicated region body
PF: predicated region fallthrough
CT: control target
= control target key end

     0   :  { %8 = vsyncpa [#allocation3], 0  ;;  %s219_s0 = inlined_call_operand.hbm [shape: f32[8,32], index: 0, kind: input, shape index: {}]   ;;  %s220_s1 = inlined_call_operand.hbm [shape: f32[32,128], index: 1, kind: input, shape index: {}]   ;;  %s221_s2 = inlined_call_operand.vmem [shape: f32[1,128], index: 2, kind: input, shape index: {}]   ;;  %s222_s3 = inlined_call_operand.hbm [shape: f32[8,128], index: 3, kind: output, shape index: {}]  }
   0x1   :  { %9 = vsyncpa [#allocation6], 0 }
   0x2   :  { %10 = vsyncpa [#allocation4], 0  ;;  %s16_s14 = sshll.u32 %s219_s0, 4  ;;  %s182_s15 = smov [#allocation2]   ;;  %s17_s14 = int_to_ptr.hbm [resolvable:$true] %s16_s14 }
   0x3   :  { %s18_s16 = sshll.u32 %s182_s15, 4  ;;  %s26_s19 = sshll.u32 %s220_s1, 4  ;;  %s19_s16 = int_to_ptr.vmem [resolvable:$true] %s18_s16  ;;  %s27_s19 = int_to_ptr.hbm [resolvable:$true] %s26_s19 }
   0x4   :  { %21 = dma.hbm_to_vmem [thread:$0]  %s17_s14, 128, %s19_s16, [#allocation3]  }
   0x5   :  { %s183_s20 = smov [#allocation5]   ;;  %s184_s22 = smov 128  }
   0x6   :  { %s28_s21 = sshll.u32 %s183_s20, 4  ;;  %s185_s23 = smov 8   ;;  %s29_s21 = int_to_ptr.vmem [resolvable:$true] %s28_s21 }
   0x7   :  { %34 = dma.hbm_to_vmem [thread:$0]  %s27_s19, 512, %s29_s21, [#allocation6], %s184_s22, %s184_s22, %s185_s23  }
   0x8   :  { %176 = dma.done.wait [#allocation3], 128  }
   0x9   :  { %177 = vsyncadd [#allocation3], 4294967168 }
   0xa   :  { %178 = dma.done.wait [#allocation6], 512  }
   0xb   :  { %179 = vsyncadd [#allocation6], 4294966784  ;;  %v49_v0 = vld [vmem:[#allocation5 + $0x18] sm:$0xff]  ;;  %v48_v1 = vld [vmem:[#allocation5 + $0x10] sm:$0xff]  ;;  %vm54_vm0 = vcmask 261120   ;;  %s186_s24 = smov [#allocation7]  }
   0xc   :  { %70 = vmatpush.msra.mxu0 %v49_v0  ;;  %v47_v2 = vld [vmem:[#allocation5 + $0x8] sm:$0xff]  ;;  %v46_v3 = vld [vmem:[#allocation5] sm:$0xff]  ;;  %v45_v4 = vld [vmem:[#allocation2] sm:$0xff]  ;;  %s84_s25 = sshll.u32 %s186_s24, 4  ;;  %s86_s28 = sshll.u32 %s222_s3, 4  ;;  %s85_s25 = int_to_ptr.vmem [resolvable:$true] %s84_s25  ;;  %s87_s28 = int_to_ptr.hbm [resolvable:$true] %s86_s28 }
   0xd   :  { %v103_v5 = vld [vmem:[%s221_s2] ss:$0 sm:$0xff] }
   0xe   :  { %71 = vmatpush.msra.mxu0 %v48_v1 }
  0x10   :  { %72 = vmatpush.msra.mxu0 %v47_v2 }
  0x12   :  { %73 = vmatpush.msra.mxu0 %v46_v3 }
  0x13   :  { %97 = vmatmul.msk.f32.vlgmr.msra.gmra.mxu0 %vm54_vm0, %v45_v4 }
  0x90   :  { %v75_v6 = vpop.f32.mrf.mxu0 }
  0x91   :  { %v76_v7 = vadd.f32 %v103_v5, %v75_v6 }
  0x93   :  { %78 = vst [vmem:[#allocation7] sm:$0xff] %v76_v7 }
  0x94   :  { %89 = dma.vmem_to_hbm [thread:$0]  %s85_s25, 128, %s87_s28, [#allocation4]  }
  0x95   :  { %180 = dma.done.wait [#allocation4], 128  }
  0x96   :  { %181 = vsyncadd [#allocation4], 4294967168 }
  0x97   :  { %94 = vsyncpa [#allocation3], 1 }
  0x98   :  { %95 = vsyncpa [#allocation6], 1 }
  0x99   :  { %96 = vsyncpa [#allocation4], 1 }

</bundles_post_ra>
